<compile_context>
chip_gen: v5e
topology: v5e:2x2
jax: 0.10.0
libtpu: 0.0.40
codegen_flags: <defaults>
</compile_context>

<pallas_src>
import functools

import jax
import jax.numpy as jnp
from jax.experimental import pallas as pl
from jax.experimental.pallas import tpu as pltpu

HIDDEN = 50
# Total VMEM budget for the double-buffered streamed tiles (x + out), bytes.
# Kept small enough that the whole kernel fits v7x's 64 MiB physical VMEM and
# v5e/v6e comfortably, while still giving multi-MiB tiles (near HBM roofline).
VMEM_TILE_BUDGET = 24 * 1024 * 1024


def _round_up(n, m):
    return ((n + m - 1) // m) * m


def _mlp_kernel(x_ref, w1_ref, b1_ref, w2_ref, b2_ref, o_ref, *,
                with_softmax, total_rows, tile_b, ragged):
    # x:  [tile_b, D]   w1: [D, 50]   b1: [1, 50]
    # w2: [50, C]       b2: [1, C]    o:  [tile_b, C]
    x = x_ref[...]

    # Linear 1 + ReLU (MXU matmul, f32 accumulate; x/w1 may be bf16).
    h = jnp.dot(x, w1_ref[...], preferred_element_type=jnp.float32) + b1_ref[...]
    h = jnp.maximum(h, 0.0)

    # Linear 2 (f32).
    logits = jnp.dot(h, w2_ref[...], preferred_element_type=jnp.float32) + b2_ref[...]

    if ragged:
        # The trailing block of an uneven grid contains undefined rows; zero
        # their logits so exp() can't generate inf/NaN.  Stores to those rows
        # are dropped by Pallas, so valid rows are unaffected either way.
        row = (jax.lax.broadcasted_iota(jnp.int32, (tile_b, 1), 0)
               + pl.program_id(0) * tile_b)
        logits = jnp.where(row < total_rows, logits, 0.0)

    if with_softmax:
        # Numerically-stable softmax over axis 1, exact normalization
        # (rows sum to 1 to f32 rounding).  Cost is noise vs. the HBM stream.
        m = jnp.max(logits, axis=1, keepdims=True)
        e = jnp.exp(logits - m)
        out = e / jnp.sum(e, axis=1, keepdims=True)
    else:
        out = logits

    o_ref[...] = out.astype(o_ref.dtype)


def classifier_forward(x, params, input_size, with_softmax=True,
                       out_dtype=jnp.float32, tile_b=None,
                       min_pallas_rows=512,
                       vmem_tile_budget_bytes=VMEM_TILE_BUDGET):
    """Pallas equivalent of Classifier.forward.

    x: any shape whose total element count is divisible by input_size
       (mirrors torch's x.view(-1, input_size)); f32 or bf16.
    out_dtype: dtype of the returned probabilities / logits (bf16 halves
       writeback bytes if the consumer tolerates it).
    """
    w1, b1, w2, b2 = params
    C = w2.shape[1]

    # No dtype cast here: an astype on x would be an extra un-fused HBM pass.
    x2d = jnp.reshape(x, (-1, input_size))
    B, D = x2d.shape

    # Tiny batches: pallas_call launch + DMA setup exceeds the whole compute;
    # plain XLA fusion wins.  (Pass tile_b explicitly to force the kernel.)
    if tile_b is None and B < min_pallas_rows:
        return reference_forward(x, params, input_size,
                                 with_softmax=with_softmax).astype(out_dtype)

    itemsize = x2d.dtype.itemsize
    out_itemsize = jnp.dtype(out_dtype).itemsize
    sublane = 16 if x2d.dtype == jnp.bfloat16 else 8

    if tile_b is None:
        # VMEM lane-pads the last dim to a multiple of 128; both x and out
        # tiles are double-buffered.
        per_row = (2 * _round_up(D, 128) * itemsize
                   + 2 * _round_up(C, 128) * out_itemsize)
        rows_cap = max(sublane, vmem_tile_budget_bytes // per_row)
        rows_cap = max(sublane, (rows_cap // sublane) * sublane)
        # >= 2 grid steps so ("parallel",) can use both v7x TensorCores.
        half = _round_up(pl.cdiv(B, 2), sublane)
        tile_b = min(rows_cap, max(sublane, half))
    tile_b = max(sublane, _round_up(tile_b, sublane))

    grid = (pl.cdiv(B, tile_b),)
    ragged = (B % tile_b) != 0

    # Match w1's dtype to the streamed x dtype for the first MXU matmul
    # (one-off, tiny — not a per-call HBM pass over activations).
    w1c = w1 if w1.dtype == x2d.dtype else w1.astype(x2d.dtype)

    kernel = functools.partial(_mlp_kernel, with_softmax=with_softmax,
                               total_rows=B, tile_b=tile_b, ragged=ragged)

    # Rough resident-VMEM need (lane/sublane padded, double-buffered) so the
    # scoped limit is explicit and fits all of v5e / v6e / v7x.
    # TODO(synk): weights could be single-buffered via pipeline_mode=pl.Buffered(1)
    # (grid-invariant index_map); kept double-buffered here for portability.
    x_bytes = 2 * tile_b * _round_up(D, 128) * itemsize
    o_bytes = 2 * tile_b * _round_up(C, 128) * out_itemsize
    w_bytes = 2 * (_round_up(D, 8) * 128 * itemsize            # w1 (50 -> 128 lanes)
                   + 8 * 128 * itemsize                        # b1
                   + _round_up(HIDDEN, 8) * _round_up(C, 128) * 4   # w2
                   + 8 * _round_up(C, 128) * 4)                # b2
    need = x_bytes + o_bytes + w_bytes
    vmem_limit = int(min(48 * 1024 * 1024,
                         max(32 * 1024 * 1024, int(need * 1.3))))

    out = pl.pallas_call(
        kernel,
        out_shape=jax.ShapeDtypeStruct((B, C), out_dtype),
        grid=grid,
        in_specs=[
            # Streamed (double-buffered) batch tile of x.
            pl.BlockSpec((tile_b, D), lambda i: (i, 0)),
            # Weights / biases: grid-invariant resident VMEM blocks.
            pl.BlockSpec((D, HIDDEN), lambda i: (0, 0)),
            pl.BlockSpec((1, HIDDEN), lambda i: (0, 0)),
            pl.BlockSpec((HIDDEN, C), lambda i: (0, 0)),
            pl.BlockSpec((1, C), lambda i: (0, 0)),
        ],
        # Output tile keeps the full (tiny) class dim; no lane padding of the
        # logical array (writeback is small vs. the x read stream).
        out_specs=pl.BlockSpec((tile_b, C), lambda i: (i, 0)),
        compiler_params=pltpu.CompilerParams(
            # Batch rows are independent -> shard grid across v7x's 2 TCs.
            dimension_semantics=("parallel",),
            vmem_limit_bytes=vmem_limit,
        ),
    )(x2d, w1c, b1, w2, b2)
    return out


def init_params(key, input_size, num_outputs):
    """Deterministic init matching nn.Linear shapes (uniform +/- 1/sqrt(fan_in))."""
    k1, k2, k3, k4 = jax.random.split(key, 4)
    lim1 = 1.0 / jnp.sqrt(jnp.float32(input_size))
    lim2 = 1.0 / jnp.sqrt(jnp.float32(HIDDEN))
    # stored [in, out] so the kernel does x @ W
    w1 = jax.random.uniform(k1, (input_size, HIDDEN), jnp.float32, -lim1, lim1)
    b1 = jax.random.uniform(k2, (1, HIDDEN), jnp.float32, -lim1, lim1)
    w2 = jax.random.uniform(k3, (HIDDEN, num_outputs), jnp.float32, -lim2, lim2)
    b2 = jax.random.uniform(k4, (1, num_outputs), jnp.float32, -lim2, lim2)
    return (w1, b1, w2, b2)


def reference_forward(x, params, input_size, with_softmax=True):
    """Pure-JAX reference of the PyTorch forward (correctness check / fallback)."""
    x2d = jnp.reshape(x, (-1, input_size)).astype(jnp.float32)
    w1, b1, w2, b2 = params
    h = jnp.maximum(x2d @ w1 + b1, 0.0)
    logits = h @ w2 + b2
    if with_softmax:
        return jax.nn.softmax(logits, axis=1)
    return logits


if __name__ == "__main__":
    input_size = 32
    num_outputs = 10

    key = jax.random.PRNGKey(0)
    kx, kp, kx2 = jax.random.split(key, 3)
    params = init_params(kp, input_size, num_outputs)

    # (1) Small multi-dim input (mirrors x.view(-1, input_size)): (2,4,4,8) -> (8, 32).
    x_small = jax.random.normal(kx, (2, 4, 4, 8), jnp.float32)
    ref = reference_forward(x_small, params, input_size)
    out = jax.block_until_ready(
        classifier_forward(x_small, params, input_size, tile_b=8))  # force Pallas path
    assert out.shape == (8, num_outputs)
    assert jnp.allclose(out, ref, atol=5e-3, rtol=5e-3)
    assert jnp.allclose(jnp.sum(out, axis=1), jnp.ones((8,)), atol=1e-3)

    # (2) Ragged batch (not a tile multiple) -> 2 grid steps + masked tail block.
    B2 = 200
    x_big = jax.random.normal(kx2, (B2, input_size), jnp.float32)
    ref2 = reference_forward(x_big, params, input_size)
    out2 = jax.block_until_ready(
        classifier_forward(x_big, params, input_size, tile_b=128))
    assert out2.shape == (B2, num_outputs)
    assert jnp.allclose(out2, ref2, atol=5e-3, rtol=5e-3)
    assert jnp.allclose(jnp.sum(out2, axis=1), jnp.ones((B2,)), atol=1e-3)

    # (3) with_softmax=False path (raw logits) via Pallas.
    ref_logits = reference_forward(x_small, params, input_size, with_softmax=False)
    logits = jax.block_until_ready(
        classifier_forward(x_small, params, input_size, with_softmax=False, tile_b=8))
    assert jnp.allclose(logits, ref_logits, atol=2e-2, rtol=2e-2)

    # (4) Tiny-batch auto-fallback (pure XLA fusion) sanity.
    out_fb = jax.block_until_ready(classifier_forward(x_small, params, input_size))
    assert jnp.allclose(out_fb, ref, atol=1e-5, rtol=1e-5)

    print("KERNEL_OK")
</pallas_src>

<mosaic_0001>
module attributes {stable_mosaic.version = 11 : i64} {
  func.func @_mlp_kernel(%arg0: i32, %arg1: memref<8x32xf32, #tpu.memory_space<vmem>>, %arg2: memref<32x50xf32, #tpu.memory_space<vmem>>, %arg3: memref<1x50xf32, #tpu.memory_space<vmem>>, %arg4: memref<50x10xf32, #tpu.memory_space<vmem>>, %arg5: memref<1x10xf32, #tpu.memory_space<vmem>>, %arg6: memref<8x10xf32, #tpu.memory_space<vmem>>) attributes {dimension_semantics = [#tpu.dimension_semantics<parallel>], iteration_bounds = array<i64: 1>, scalar_prefetch = 0 : i64, scratch_operands = 0 : i64, tpu.core_type = #tpu.core_type<tc>, window_params = [{transform_indices = @transform_0, window_bounds = array<i64: 8, 32>}, {pipeline_mode = #tpu.pipeline_mode<synchronous>, transform_indices = @transform_1, window_bounds = array<i64: 32, 50>}, {pipeline_mode = #tpu.pipeline_mode<synchronous>, transform_indices = @transform_2, window_bounds = array<i64: 1, 50>}, {pipeline_mode = #tpu.pipeline_mode<synchronous>, transform_indices = @transform_3, window_bounds = array<i64: 50, 10>}, {pipeline_mode = #tpu.pipeline_mode<synchronous>, transform_indices = @transform_4, window_bounds = array<i64: 1, 10>}, {transform_indices = @transform_5, window_bounds = array<i64: 8, 10>}]} {
    %c0 = arith.constant 0 : index
    %c0_0 = arith.constant 0 : index
    %0 = vector.load %arg1[%c0, %c0_0] : memref<8x32xf32, #tpu.memory_space<vmem>>, vector<8x32xf32>
    %c0_1 = arith.constant 0 : index
    %c0_2 = arith.constant 0 : index
    %1 = vector.load %arg2[%c0_1, %c0_2] : memref<32x50xf32, #tpu.memory_space<vmem>>, vector<32x50xf32>
    %cst = arith.constant dense<0.000000e+00> : vector<8x50xf32>
    %2 = tpu.matmul %0, %1, %cst {dimension_numbers = #tpu.dot_dimension_numbers<[1], [0], [0], [1], [0, 0, 1, 1], [], []>} : vector<8x32xf32>, vector<32x50xf32>, vector<8x50xf32> -> vector<8x50xf32>
    %c0_3 = arith.constant 0 : index
    %c0_4 = arith.constant 0 : index
    %3 = vector.load %arg3[%c0_3, %c0_4] : memref<1x50xf32, #tpu.memory_space<vmem>>, vector<1x50xf32>
    %4 = vector.broadcast %3 : vector<1x50xf32> to vector<8x50xf32>
    %5 = arith.addf %2, %4 : vector<8x50xf32>
    %cst_5 = arith.constant 0.000000e+00 : f32
    %6 = vector.broadcast %cst_5 : f32 to vector<8x50xf32>
    %7 = arith.maximumf %5, %6 : vector<8x50xf32>
    %c0_6 = arith.constant 0 : index
    %c0_7 = arith.constant 0 : index
    %8 = vector.load %arg4[%c0_6, %c0_7] : memref<50x10xf32, #tpu.memory_space<vmem>>, vector<50x10xf32>
    %cst_8 = arith.constant dense<0.000000e+00> : vector<8x10xf32>
    %9 = tpu.matmul %7, %8, %cst_8 {dimension_numbers = #tpu.dot_dimension_numbers<[1], [0], [0], [1], [0, 0, 1, 1], [], []>} : vector<8x50xf32>, vector<50x10xf32>, vector<8x10xf32> -> vector<8x10xf32>
    %c0_9 = arith.constant 0 : index
    %c0_10 = arith.constant 0 : index
    %10 = vector.load %arg5[%c0_9, %c0_10] : memref<1x10xf32, #tpu.memory_space<vmem>>, vector<1x10xf32>
    %11 = vector.broadcast %10 : vector<1x10xf32> to vector<8x10xf32>
    %12 = arith.addf %9, %11 : vector<8x10xf32>
    %cst_11 = arith.constant dense<0xFF800000> : vector<8xf32>
    %13 = vector.multi_reduction <maximumf>, %12, %cst_11 [1] : vector<8x10xf32> to vector<8xf32>
    %14 = vector.shape_cast %13 : vector<8xf32> to vector<8x1xf32>
    %15 = vector.broadcast %14 : vector<8x1xf32> to vector<8x10xf32>
    %16 = arith.subf %12, %15 : vector<8x10xf32>
    %17 = math.exp %16 : vector<8x10xf32>
    %cst_12 = arith.constant dense<0.000000e+00> : vector<8xf32>
    %18 = vector.multi_reduction <add>, %17, %cst_12 [1] : vector<8x10xf32> to vector<8xf32>
    %19 = vector.shape_cast %18 : vector<8xf32> to vector<8x1xf32>
    %20 = vector.broadcast %19 : vector<8x1xf32> to vector<8x10xf32>
    %21 = arith.divf %17, %20 : vector<8x10xf32>
    %c0_13 = arith.constant 0 : index
    %c0_14 = arith.constant 0 : index
    %22 = vector.load %arg6[%c0_13, %c0_14] : memref<8x10xf32, #tpu.memory_space<vmem>>, vector<8x10xf32>
    tpu.vector_store %arg6[%c0_13, %c0_14], %21 {strides = array<i32>} : memref<8x10xf32, #tpu.memory_space<vmem>>, vector<8x10xf32>,
    return
  }
  func.func @transform_0(%arg0: i32) -> (i32, i32) {
    %c0_i32 = arith.constant 0 : i32
    %c0_i32_0 = arith.constant 0 : i32
    return %arg0, %c0_i32 : i32, i32
  }
  func.func @transform_1(%arg0: i32) -> (i32, i32) {
    %c0_i32 = arith.constant 0 : i32
    %c0_i32_0 = arith.constant 0 : i32
    %c0_i32_1 = arith.constant 0 : i32
    return %c0_i32, %c0_i32_0 : i32, i32
  }
  func.func @transform_2(%arg0: i32) -> (i32, i32) {
    %c0_i32 = arith.constant 0 : i32
    %c0_i32_0 = arith.constant 0 : i32
    %c0_i32_1 = arith.constant 0 : i32
    return %c0_i32, %c0_i32_0 : i32, i32
  }
  func.func @transform_3(%arg0: i32) -> (i32, i32) {
    %c0_i32 = arith.constant 0 : i32
    %c0_i32_0 = arith.constant 0 : i32
    %c0_i32_1 = arith.constant 0 : i32
    return %c0_i32, %c0_i32_0 : i32, i32
  }
  func.func @transform_4(%arg0: i32) -> (i32, i32) {
    %c0_i32 = arith.constant 0 : i32
    %c0_i32_0 = arith.constant 0 : i32
    %c0_i32_1 = arith.constant 0 : i32
    return %c0_i32, %c0_i32_0 : i32, i32
  }
  func.func @transform_5(%arg0: i32) -> (i32, i32) {
    %c0_i32 = arith.constant 0 : i32
    %c0_i32_0 = arith.constant 0 : i32
    return %arg0, %c0_i32 : i32, i32
  }
}

</mosaic_0001>

<bundles_post_ra>
// kernel: tpu_custom_call.1
= control target key start
LH: loop header
LB: loop body
LE: loop exit
PB: predicated region body
PF: predicated region fallthrough
CT: control target
= control target key end

     0   :  { %vm70_vm0 = vcmask 1041408   ;;  %s251_s0 = inlined_call_operand.vmem [shape: f32[8,32], index: 0, kind: input, shape index: {}]   ;;  %s252_s1 = inlined_call_operand.vmem [shape: f32[32,50], index: 1, kind: input, shape index: {}]   ;;  %s253_s2 = inlined_call_operand.vmem [shape: f32[1,50], index: 2, kind: input, shape index: {}]   ;;  %s254_s3 = inlined_call_operand.vmem [shape: f32[50,10], index: 3, kind: input, shape index: {}]   ;;  %s255_s4 = inlined_call_operand.vmem [shape: f32[1,10], index: 4, kind: input, shape index: {}]   ;;  %s256_s5 = inlined_call_operand.hbm [shape: f32[8,10], index: 5, kind: output, shape index: {}]  }
   0x1   :  { %v25_v0 = vld [vmem:[%s252_s1 + $0x18] sm:$0xff]  ;;  %v24_v1 = vld [vmem:[%s252_s1 + $0x10] sm:$0xff]  ;;  %v23_v3 = vld [vmem:[%s252_s1 + $0x8] sm:$0xff] }
   0x2   :  { %46 = vmatpush.msra.mxu0 %v25_v0  ;;  %v61_v2 = vld [vmem:[%s254_s3 + $0x30] sm:$0x3]  ;;  %v60_v4 = vld [vmem:[%s254_s3 + $0x28] sm:$0xff]  ;;  %v59_v5 = vld [vmem:[%s254_s3 + $0x20] sm:$0xff] }
   0x3   :  { %137 = vmatpush.msk.msra.mxu1 %vm70_vm0, %v61_v2  ;;  %v22_v6 = vld [vmem:[%s252_s1] sm:$0xff] }
   0x4   :  { %47 = vmatpush.msra.mxu0 %v24_v1 }
   0x5   :  { %84 = vmatpush.msra.mxu1 %v60_v4 }
   0x6   :  { %10 = vsyncpa [#allocation3], 0  ;;  %48 = vmatpush.msra.mxu0 %v23_v3  ;;  %v21_v7 = vld [vmem:[%s251_s0] sm:$0xff]  ;;  %vm30_vm1 = vcmask 261120   ;;  %v58_v8 = vld [vmem:[%s254_s3 + $0x18] sm:$0xff]  ;;  %vm66_vm2 = vcmask 408576  }
   0x7   :  { %85 = vmatpush.msra.mxu1 %v59_v5  ;;  %v57_v9 = vld [vmem:[%s254_s3 + $0x10] sm:$0xff]  ;;  %v56_v10 = vld [vmem:[%s254_s3 + $0x8] sm:$0xff]  ;;  %v55_v11 = vld [vmem:[%s254_s3] sm:$0xff]  ;;  %vm94_vm3 = vcmask 80896   ;;  %s127_s20 = sshll.u32 %s256_s5, 4  ;;  %s128_s20 = int_to_ptr.hbm [resolvable:$true] %s127_s20 }
   0x8   :  { %49 = vmatpush.msra.mxu0 %v22_v6  ;;  %v140_v12 = vld [vmem:[%s253_s2] ss:$0 sm:$0xff]  ;;  %s172_s2 = smov [#allocation2]  }
   0x9   :  { %136 = vmatmul.msk.f32.vlgmr.msra.gmra.mxu0 %vm30_vm1, %v21_v7  ;;  %86 = vmatpush.msra.mxu1 %v58_v8  ;;  %v141_v16 = vld [vmem:[%s255_s4] ss:$0 sm:$0xff]  ;;  %s125_s3 = sshll.u32 %s172_s2, 4  ;;  %s126_s3 = int_to_ptr.vmem [resolvable:$true] %s125_s3 }
   0xb   :  { %87 = vmatpush.msra.mxu1 %v57_v9 }
   0xd   :  { %88 = vmatpush.msra.mxu1 %v56_v10 }
   0xf   :  { %89 = vmatpush.msra.mxu1 %v55_v11 }
  0x86   :  { %v51_v13 = vpop.f32.mrf.mxu0 }
  0x87   :  { %v52_v14 = vadd.f32 %v140_v12, %v51_v13 }
  0x89   :  { %v54_v15 = vmax.f32 %v52_v14, 0.0 }
  0x8b   :  { %138 = vmatmul.msk.f32.vlgmr.msra.gmra.mxu1 %vm66_vm2, %v54_v15 }
 0x108   :  { %v91_v17 = vpop.f32.mrf.mxu1 }
 0x109   :  { %v92_v18 = vadd.f32 %v141_v16, %v91_v17 }
 0x10b   :  { %v95_v19 = vsel %vm94_vm3, %v92_v18, -inf }
 0x10c   :  { %96 = vmax.xlane.f32.xlu0 %v95_v19 }
 0x17f   :  { %v97_v20 = vpop.xlane.xlu0 %96 }
 0x180   :  { %v98_v21 = vsub.f32 %v92_v18, %v97_v20 }
 0x182   :  { %v99_v22 = vmul.f32 1.442695, %v98_v21 }
 0x184   :  { %142 = vpow2.f32 %v99_v22 }
 0x18a   :  { %v143_v23 = vpop.eup %142 }
 0x18b   :  { %v101_v24 = vsel %vm94_vm3, %v143_v23, 0.0 }
 0x18c   :  { %102 = vadd.xlane.f32.xlu0 %v101_v24 }
 0x1ff   :  { %v103_v25 = vpop.xlane.xlu0 %102 }
 0x200   :  { %144 = vrcp.f32 %v103_v25  ;;  %v115_v29 = vand.u32 2147483648, %v103_v25  ;;  %v113_v31 = vand.u32 2147483647, %v103_v25  ;;  %vm109_vm5 = vweird.f32 %v103_v25 }
 0x202   :  { %v116_v33 = vor.u32 1.1754944e-38, %v115_v29  ;;  %vm114_vm7 = vcmp.eq.f32.partialorder %v113_v31, 8.507059e+37 }
 0x206   :  { %v145_v26 = vpop.eup %144 }
 0x207   :  { %v105_v27 = vmul.f32 %v145_v26, %v103_v25  ;;  %vm110_vm4 = vweird.f32 %v145_v26 }
 0x208   :  { %vm111_vm6 = vmor %vm109_vm5, %vm110_vm4 }
 0x209   :  { %v106_v28 = vsub.f32 1.0, %v105_v27 }
 0x20b   :  { %v107_v30 = vmul.f32 %v145_v26, %v106_v28 }
 0x20d   :  { %v108_v32 = vadd.f32 %v145_v26, %v107_v30 }
 0x20f   :  { %v112_v34 = vsel %vm111_vm6, %v145_v26, %v108_v32 }
 0x210   :  { %v117_v35 = vsel %vm114_vm7, %v116_v33, %v112_v34 }
 0x211   :  { %v118_v36 = vmul.f32 %v143_v23, %v117_v35 }
 0x213   :  { %119 = vst.msk [vmem:[#allocation2] sm:$0xff] %vm94_vm3, %v118_v36 }
 0x214   :  { %130 = dma.vmem_to_hbm [thread:$0]  %s126_s3, 128, %s128_s20, [#allocation3]  }
 0x215   :  { %170 = dma.done.wait [#allocation3], 128  }
 0x216   :  { %171 = vsyncadd [#allocation3], 4294967168 }
 0x217   :  { %135 = vsyncpa [#allocation3], 1 }

</bundles_post_ra>
